<compile_context>
chip_gen: v6e
topology: v6e:2x2x1
jax: 0.10.0
libtpu: 0.0.40
codegen_flags: <defaults>
</compile_context>

<pallas_src>
import functools

import numpy as np

import jax
import jax.numpy as jnp
from jax.experimental import pallas as pl
from jax.experimental.pallas import tpu as pltpu

POOL_H, POOL_W = 6, 10        # AdaptiveAvgPool2d target (w=6, h=10 in the module)
POOL_S = POOL_H * POOL_W      # 60
NTAP = 9                      # 3x3 conv taps
NEG_SLOPE = 0.3               # LeakyReLU slope
IN_EPS = 1e-5                 # InstanceNorm2d eps (affine=False, biased var)


# ----------------------------------------------------------------------------
# Constant operator: adaptive average pooling + zero-padded 3x3 im2col folded
# into a single (hw, 9, 60) matrix.  Built once per (H, W) at trace time.
# ----------------------------------------------------------------------------
def _pool_patch_matrix(H, W):
    # Adaptive-pool matrix Q: window i = [floor(i*H/OH), ceil((i+1)*H/OH)).
    Q = np.zeros((H * W, POOL_H, POOL_W), np.float32)
    for i in range(POOL_H):
        hs = (i * H) // POOL_H
        he = ((i + 1) * H + POOL_H - 1) // POOL_H
        for j in range(POOL_W):
            ws = (j * W) // POOL_W
            we = ((j + 1) * W + POOL_W - 1) // POOL_W
            inv = 1.0 / float((he - hs) * (we - ws))
            for ph in range(hs, he):
                for pw in range(ws, we):
                    Q[ph * W + pw, i, j] = inv
    # Fold the 9 zero-padded shifts of the SAME 3x3 conv into the operator.
    P = np.zeros((H * W, NTAP, POOL_H, POOL_W), np.float32)
    for dy in range(3):
        for dx in range(3):
            k = dy * 3 + dx
            for i in range(POOL_H):
                ii = i + dy - 1
                if not (0 <= ii < POOL_H):
                    continue
                for j in range(POOL_W):
                    jj = j + dx - 1
                    if not (0 <= jj < POOL_W):
                        continue
                    P[:, k, i, j] = Q[:, ii, jj]
    return P.reshape(H * W, NTAP, POOL_S)


def _pick_tb(b):
    # Largest batch block that divides b while keeping >= 2 grid iterations
    # (so megacore / 2-TC sharding always has work for b >= 2).
    if b <= 1:
        return 1
    tb = 1
    for cand in range(1, min(b // 2, 8) + 1):
        if b % cand == 0:
            tb = cand
    return tb


# ----------------------------------------------------------------------------
# Pallas kernel: per batch-block fused conv (one matmul for both branches) +
# InstanceNorm + LeakyReLU, one stacked gram matmul, block softmaxes, one
# fused attention-weighted output matmul and f32 residual add.
# ----------------------------------------------------------------------------
def _ccn_kernel(xf_ref, patches_ref, ws_ref, bs_ref, e2_ref, s1_ref, s2_ref,
                w1_ref, w2_ref, out1_ref, out2_ref, *, tb, c):
    c2 = 2 * c
    w1 = w1_ref[0, 0]
    w2 = w2_ref[0, 0]

    # Constant operands (fetched once; constant index_map => no per-step DMA).
    ws = ws_ref[...]          # (2c, 9c)  stacked conv weights of both branches
    bs = bs_ref[...]          # (2c, 1)   stacked conv biases
    e2 = e2_ref[...]          # (2c, c)   [I; I]  -- column-block collapse
    s1 = s1_ref[...]          # (c, 2c)   [I  0]  -- selects branch-1 rows
    s2 = s2_ref[...]          # (c, 2c)   [0  I]  -- selects branch-2 rows

    # Block masks / per-row mixing weights, hoisted out of the batch loop.
    col = jax.lax.broadcasted_iota(jnp.int32, (c2, c2), 1)
    row = jax.lax.broadcasted_iota(jnp.int32, (c2, c2), 0)
    left = col < c
    top = row < c
    w_left = jnp.where(top, w1, 1.0 - w2)     # [[w1],[1-w2]] per row block
    w_right = jnp.where(top, 1.0 - w1, w2)    # [[1-w1],[w2]] per row block

    def blk_softmax(g):
        m = jnp.max(g, axis=-1, keepdims=True)
        e = jnp.exp(g - m)                    # masked entries: exp(-inf) = 0
        return e / jnp.sum(e, axis=-1, keepdims=True)

    for t in range(tb):
        xf = xf_ref[t]                        # (c, hw)
        patches = patches_ref[t]              # (9c, 60)

        # Fused 3x3 conv of BOTH branches: one (2c,9c)@(9c,60) MXU matmul.
        z = jnp.dot(ws, patches, preferred_element_type=jnp.float32) + bs
        # InstanceNorm2d (affine=False, biased var) per (branch, channel) row.
        mu = jnp.mean(z, axis=-1, keepdims=True)
        zc = z - mu
        var = jnp.mean(zc * zc, axis=-1, keepdims=True)
        y = zc * jax.lax.rsqrt(var + IN_EPS)
        y = jnp.where(y >= 0, y, NEG_SLOPE * y)          # LeakyReLU(0.3)

        # All four gram matrices in one matmul:
        #   G = [[y1 y1^T, y1 y2^T], [y2 y1^T, y2 y2^T]]   (2c, 2c)
        g = jax.lax.dot_general(y, y, (((1,), (1,)), ((), ())),
                                preferred_element_type=jnp.float32)
        # Row softmax over each c-wide column block separately (masked).
        sm_l = blk_softmax(jnp.where(left, g, -jnp.inf))
        sm_r = blk_softmax(jnp.where(left, -jnp.inf, g))
        # A_full blocks: [[w1*Mt1, (1-w1)*Ms1], [(1-w2)*Ms2, w2*Mt2]]
        a_full = w_left * sm_l + w_right * sm_r
        # Collapse column blocks: A = A_full @ [I; I]  -> (2c, c),
        # rows 0:c = A1, rows c:2c = A2.
        a = jnp.dot(a_full, e2, preferred_element_type=jnp.float32)

        # Single fused hw-sized matmul for both outputs (bf16 MXU inputs,
        # f32 accumulation); residual added in f32.
        big = jnp.dot(a.astype(jnp.bfloat16), xf.astype(jnp.bfloat16),
                      preferred_element_type=jnp.float32)     # (2c, hw)
        out1_ref[t] = jnp.dot(s1, big, preferred_element_type=jnp.float32) + xf
        out2_ref[t] = jnp.dot(s2, big, preferred_element_type=jnp.float32) + xf


@jax.jit
def ccn_forward(x, wc1, b1, wc2, b2, w1, w2):
    b, c, h, w = x.shape
    hw = h * w
    tb = _pick_tb(b)
    nblk = b // tb

    xf = x.reshape(b, c, hw).astype(jnp.float32)

    # Pooling + im2col as ONE matmul against a constant operator.
    PP = jnp.asarray(_pool_patch_matrix(h, w))                    # (hw, 9, 60)
    patches = jnp.einsum("bcp,pks->bkcs", xf, PP,
                         precision=jax.lax.Precision.HIGHEST)     # (b,9,c,60)
    patches = patches.reshape(b, NTAP * c, POOL_S)                # row = k*c+ci

    # Conv weights of both branches stacked to (2c, 9c); column order (k*c+ci)
    # matches the patches row order.
    def cat_w(wc):
        return jnp.transpose(wc, (0, 2, 3, 1)).reshape(c, NTAP * c)

    w_stack = jnp.concatenate([cat_w(wc1), cat_w(wc2)], axis=0).astype(jnp.float32)
    b_stack = jnp.concatenate([b1, b2]).reshape(2 * c, 1).astype(jnp.float32)

    eye_c = jnp.eye(c, dtype=jnp.float32)
    zeros_c = jnp.zeros((c, c), jnp.float32)
    e2 = jnp.concatenate([eye_c, eye_c], axis=0)                  # (2c, c)
    s1 = jnp.concatenate([eye_c, zeros_c], axis=1)                # (c, 2c)
    s2 = jnp.concatenate([zeros_c, eye_c], axis=1)                # (c, 2c)

    w1_s = jnp.asarray(w1, jnp.float32).reshape(1, 1)
    w2_s = jnp.asarray(w2, jnp.float32).reshape(1, 1)

    smem = pl.BlockSpec(memory_space=pltpu.MemorySpace.SMEM)
    cost = pl.CostEstimate(
        flops=int(b * (2 * (2 * c) * (NTAP * c) * POOL_S     # fused conv
                       + 2 * (2 * c) * (2 * c) * POOL_S      # stacked gram
                       + 2 * (2 * c) * (2 * c) * c           # A_full @ [I;I]
                       + 2 * (2 * c) * c * hw                # A @ xf
                       + 2 * 2 * c * (2 * c) * hw)),         # selector dots
        transcendentals=int(b * 2 * (2 * c) * (2 * c)),
        bytes_accessed=int(4 * b * (3 * c * hw + NTAP * c * POOL_S)
                           + 4 * 2 * c * (NTAP * c + 1 + c) + 4 * 2 * c * 2 * c))

    kernel = functools.partial(_ccn_kernel, tb=tb, c=c)

    out1, out2 = pl.pallas_call(
        kernel,
        out_shape=(jax.ShapeDtypeStruct((b, c, hw), jnp.float32),
                   jax.ShapeDtypeStruct((b, c, hw), jnp.float32)),
        grid_spec=pltpu.PrefetchScalarGridSpec(
            num_scalar_prefetch=0,
            grid=(nblk,),
            in_specs=[
                pl.BlockSpec((tb, c, hw), lambda i: (i, 0, 0)),
                pl.BlockSpec((tb, NTAP * c, POOL_S), lambda i: (i, 0, 0)),
                pl.BlockSpec((2 * c, NTAP * c), lambda i: (0, 0)),   # constant
                pl.BlockSpec((2 * c, 1), lambda i: (0, 0)),          # constant
                pl.BlockSpec((2 * c, c), lambda i: (0, 0)),          # constant
                pl.BlockSpec((c, 2 * c), lambda i: (0, 0)),          # constant
                pl.BlockSpec((c, 2 * c), lambda i: (0, 0)),          # constant
                smem,
                smem,
            ],
            out_specs=(
                pl.BlockSpec((tb, c, hw), lambda i: (i, 0, 0)),
                pl.BlockSpec((tb, c, hw), lambda i: (i, 0, 0)),
            ),
        ),
        compiler_params=pltpu.CompilerParams(
            dimension_semantics=("parallel",),
            vmem_limit_bytes=32 * 1024 * 1024),
        cost_estimate=cost,
    )(xf, patches, w_stack, b_stack, e2, s1, s2, w1_s, w2_s)

    return [out1.reshape(b, c, h, w), out2.reshape(b, c, h, w)]


# ----------------------------------------------------------------------------
# Pure-JAX reference (mirrors the PyTorch forward) for the sanity check.
# ----------------------------------------------------------------------------
def adaptive_avg_pool2d(x, out_hw):
    b, c, H, W = x.shape
    OH, OW = out_hw
    rows = []
    for i in range(OH):
        hs, he = (i * H) // OH, ((i + 1) * H + OH - 1) // OH
        cols = []
        for j in range(OW):
            ws, we = (j * W) // OW, ((j + 1) * W + OW - 1) // OW
            cols.append(jnp.mean(x[:, :, hs:he, ws:we], axis=(2, 3)))
        rows.append(jnp.stack(cols, axis=-1))
    return jnp.stack(rows, axis=-2)  # (b, c, OH, OW)


def ccn_reference(x, wc1, b1, wc2, b2, w1, w2):
    b, c, h, w = x.shape
    hi = jax.lax.Precision.HIGHEST
    y = adaptive_avg_pool2d(x, (POOL_H, POOL_W))

    def branch(wc, bias):
        z = jax.lax.conv_general_dilated(
            y, wc, (1, 1), "SAME",
            dimension_numbers=("NCHW", "OIHW", "NCHW"),
            precision=hi) + bias.reshape(1, c, 1, 1)
        z = z.reshape(b, c, -1)
        mu = z.mean(-1, keepdims=True)
        var = ((z - mu) ** 2).mean(-1, keepdims=True)
        z = (z - mu) / jnp.sqrt(var + IN_EPS)
        return jnp.where(z >= 0, z, NEG_SLOPE * z)

    yt1, yt2 = branch(wc1, b1), branch(wc2, b2)
    sm = functools.partial(jax.nn.softmax, axis=-1)
    gram = lambda a, b_: jnp.einsum("bij,bkj->bik", a, b_, precision=hi)
    M_t1, M_t2 = sm(gram(yt1, yt1)), sm(gram(yt2, yt2))
    M_s1, M_s2 = sm(gram(yt1, yt2)), sm(gram(yt2, yt1))
    xf = x.reshape(b, c, -1)
    A1 = w1 * M_t1 + (1 - w1) * M_s1
    A2 = w2 * M_t2 + (1 - w2) * M_s2
    o1 = jnp.einsum("bij,bjk->bik", A1, xf, precision=hi).reshape(b, c, h, w) + x
    o2 = jnp.einsum("bij,bjk->bik", A2, xf, precision=hi).reshape(b, c, h, w) + x
    return [o1, o2]


if __name__ == "__main__":
    key = jax.random.PRNGKey(0)
    kx, k1, k2, k3, k4 = jax.random.split(key, 5)
    B, C, H, W = 2, 4, 16, 16
    x = jax.random.normal(kx, (B, C, H, W), jnp.float32)
    # Deterministic synthetic parameters (Conv2d(ch, ch, 3) weights/biases, w1, w2).
    wc1 = jax.random.normal(k1, (C, C, 3, 3), jnp.float32) * 0.1
    b1 = jax.random.normal(k2, (C,), jnp.float32) * 0.1
    wc2 = jax.random.normal(k3, (C, C, 3, 3), jnp.float32) * 0.1
    b2 = jax.random.normal(k4, (C,), jnp.float32) * 0.1
    w1 = jnp.full((1,), 0.5, jnp.float32)
    w2 = jnp.full((1,), 0.5, jnp.float32)

    out1, out2 = ccn_forward(x, wc1, b1, wc2, b2, w1, w2)
    jax.block_until_ready((out1, out2))

    ref1, ref2 = ccn_reference(x, wc1, b1, wc2, b2, w1, w2)
    assert out1.shape == (B, C, H, W) and out2.shape == (B, C, H, W)
    # 2e-2 tolerance: the hw-sized output matmul uses the bf16 MXU path
    # (f32 accumulation); all norm/softmax math stays in f32.
    assert jnp.allclose(out1, ref1, atol=2e-2, rtol=2e-2)
    assert jnp.allclose(out2, ref2, atol=2e-2, rtol=2e-2)
    print("KERNEL_OK")
</pallas_src>

<mosaic_0001>
module attributes {stable_mosaic.version = 11 : i64} {
  func.func @_ccn_kernel(%arg0: i32, %arg1: memref<1x4x256xf32, #tpu.memory_space<vmem>>, %arg2: memref<1x36x60xf32, #tpu.memory_space<vmem>>, %arg3: memref<8x36xf32, #tpu.memory_space<vmem>>, %arg4: memref<8x1xf32, #tpu.memory_space<vmem>>, %arg5: memref<8x4xf32, #tpu.memory_space<vmem>>, %arg6: memref<4x8xf32, #tpu.memory_space<vmem>>, %arg7: memref<4x8xf32, #tpu.memory_space<vmem>>, %arg8: memref<1x1xf32, #tpu.memory_space<smem>>, %arg9: memref<1x1xf32, #tpu.memory_space<smem>>, %arg10: memref<1x4x256xf32, #tpu.memory_space<vmem>>, %arg11: memref<1x4x256xf32, #tpu.memory_space<vmem>>) attributes {dimension_semantics = [#tpu.dimension_semantics<parallel>], iteration_bounds = array<i64: 2>, scalar_prefetch = 0 : i64, scratch_operands = 0 : i64, tpu.core_type = #tpu.core_type<tc>, window_params = [{transform_indices = @transform_0, window_bounds = array<i64: 1, 4, 256>}, {transform_indices = @transform_1, window_bounds = array<i64: 1, 36, 60>}, {pipeline_mode = #tpu.pipeline_mode<synchronous>, transform_indices = @transform_2, window_bounds = array<i64: 8, 36>}, {pipeline_mode = #tpu.pipeline_mode<synchronous>, transform_indices = @transform_3, window_bounds = array<i64: 8, 1>}, {pipeline_mode = #tpu.pipeline_mode<synchronous>, transform_indices = @transform_4, window_bounds = array<i64: 8, 4>}, {pipeline_mode = #tpu.pipeline_mode<synchronous>, transform_indices = @transform_5, window_bounds = array<i64: 4, 8>}, {pipeline_mode = #tpu.pipeline_mode<synchronous>, transform_indices = @transform_6, window_bounds = array<i64: 4, 8>}, {transform_indices = @transform_7, window_bounds = array<i64: 1, 1>}, {transform_indices = @transform_8, window_bounds = array<i64: 1, 1>}, {transform_indices = @transform_9, window_bounds = array<i64: 1, 4, 256>}, {transform_indices = @transform_10, window_bounds = array<i64: 1, 4, 256>}]} {
    %c0 = arith.constant 0 : index
    %c0_0 = arith.constant 0 : index
    %0 = memref.load %arg8[%c0, %c0_0] : memref<1x1xf32, #tpu.memory_space<smem>>
    %c0_1 = arith.constant 0 : index
    %c0_2 = arith.constant 0 : index
    %1 = memref.load %arg9[%c0_1, %c0_2] : memref<1x1xf32, #tpu.memory_space<smem>>
    %c0_3 = arith.constant 0 : index
    %c0_4 = arith.constant 0 : index
    %2 = vector.load %arg3[%c0_3, %c0_4] : memref<8x36xf32, #tpu.memory_space<vmem>>, vector<8x36xf32>
    %c0_5 = arith.constant 0 : index
    %c0_6 = arith.constant 0 : index
    %3 = vector.load %arg4[%c0_5, %c0_6] : memref<8x1xf32, #tpu.memory_space<vmem>>, vector<8x1xf32>
    %c0_7 = arith.constant 0 : index
    %c0_8 = arith.constant 0 : index
    %4 = vector.load %arg5[%c0_7, %c0_8] : memref<8x4xf32, #tpu.memory_space<vmem>>, vector<8x4xf32>
    %c0_9 = arith.constant 0 : index
    %c0_10 = arith.constant 0 : index
    %5 = vector.load %arg6[%c0_9, %c0_10] : memref<4x8xf32, #tpu.memory_space<vmem>>, vector<4x8xf32>
    %c0_11 = arith.constant 0 : index
    %c0_12 = arith.constant 0 : index
    %6 = vector.load %arg7[%c0_11, %c0_12] : memref<4x8xf32, #tpu.memory_space<vmem>>, vector<4x8xf32>
    %7 = tpu.iota {dimensions = array<i32: 1>} : vector<8x8xi32>
    %8 = tpu.iota {dimensions = array<i32: 0>} : vector<8x8xi32>
    %c4_i32 = arith.constant 4 : i32
    %9 = vector.broadcast %c4_i32 : i32 to vector<8x8xi32>
    %10 = arith.cmpi slt, %7, %9 : vector<8x8xi32>
    %c4_i32_13 = arith.constant 4 : i32
    %11 = vector.broadcast %c4_i32_13 : i32 to vector<8x8xi32>
    %12 = arith.cmpi slt, %8, %11 : vector<8x8xi32>
    %cst = arith.constant 1.000000e+00 : f32
    %13 = arith.subf %cst, %1 : f32
    %14 = vector.broadcast %0 : f32 to vector<8x8xf32>
    %15 = vector.broadcast %13 : f32 to vector<8x8xf32>
    %16 = arith.select %12, %14, %15 : vector<8x8xi1>, vector<8x8xf32>
    %cst_14 = arith.constant 1.000000e+00 : f32
    %17 = arith.subf %cst_14, %0 : f32
    %18 = vector.broadcast %17 : f32 to vector<8x8xf32>
    %19 = vector.broadcast %1 : f32 to vector<8x8xf32>
    %20 = arith.select %12, %18, %19 : vector<8x8xi1>, vector<8x8xf32>
    %c0_15 = arith.constant 0 : index
    %c0_16 = arith.constant 0 : index
    %c0_17 = arith.constant 0 : index
    %21 = vector.load %arg1[%c0_15, %c0_16, %c0_17] : memref<1x4x256xf32, #tpu.memory_space<vmem>>, vector<1x4x256xf32>
    %22 = vector.shape_cast %21 : vector<1x4x256xf32> to vector<4x256xf32>
    %c0_18 = arith.constant 0 : index
    %c0_19 = arith.constant 0 : index
    %c0_20 = arith.constant 0 : index
    %23 = vector.load %arg2[%c0_18, %c0_19, %c0_20] : memref<1x36x60xf32, #tpu.memory_space<vmem>>, vector<1x36x60xf32>
    %24 = vector.shape_cast %23 : vector<1x36x60xf32> to vector<36x60xf32>
    %cst_21 = arith.constant dense<0.000000e+00> : vector<8x60xf32>
    %25 = tpu.matmul %2, %24, %cst_21 {dimension_numbers = #tpu.dot_dimension_numbers<[1], [0], [0], [1], [0, 0, 1, 1], [], []>} : vector<8x36xf32>, vector<36x60xf32>, vector<8x60xf32> -> vector<8x60xf32>
    %26 = vector.broadcast %3 : vector<8x1xf32> to vector<8x60xf32>
    %27 = arith.addf %25, %26 : vector<8x60xf32>
    %cst_22 = arith.constant dense<0.000000e+00> : vector<8xf32>
    %28 = vector.multi_reduction <add>, %27, %cst_22 [1] : vector<8x60xf32> to vector<8xf32>
    %29 = vector.shape_cast %28 : vector<8xf32> to vector<8x1xf32>
    %cst_23 = arith.constant 6.000000e+01 : f32
    %30 = vector.broadcast %cst_23 : f32 to vector<8x1xf32>
    %31 = arith.divf %29, %30 : vector<8x1xf32>
    %32 = vector.broadcast %31 : vector<8x1xf32> to vector<8x60xf32>
    %33 = arith.subf %27, %32 : vector<8x60xf32>
    %34 = arith.mulf %33, %33 : vector<8x60xf32>
    %cst_24 = arith.constant dense<0.000000e+00> : vector<8xf32>
    %35 = vector.multi_reduction <add>, %34, %cst_24 [1] : vector<8x60xf32> to vector<8xf32>
    %36 = vector.shape_cast %35 : vector<8xf32> to vector<8x1xf32>
    %cst_25 = arith.constant 6.000000e+01 : f32
    %37 = vector.broadcast %cst_25 : f32 to vector<8x1xf32>
    %38 = arith.divf %36, %37 : vector<8x1xf32>
    %cst_26 = arith.constant 9.99999974E-6 : f32
    %39 = vector.broadcast %cst_26 : f32 to vector<8x1xf32>
    %40 = arith.addf %38, %39 : vector<8x1xf32>
    %41 = math.rsqrt %40 : vector<8x1xf32>
    %42 = vector.broadcast %41 : vector<8x1xf32> to vector<8x60xf32>
    %43 = arith.mulf %33, %42 : vector<8x60xf32>
    %cst_27 = arith.constant 0.000000e+00 : f32
    %44 = vector.broadcast %cst_27 : f32 to vector<8x60xf32>
    %45 = arith.cmpf oge, %43, %44 : vector<8x60xf32>
    %cst_28 = arith.constant 3.000000e-01 : f32
    %46 = vector.broadcast %cst_28 : f32 to vector<8x60xf32>
    %47 = arith.mulf %46, %43 : vector<8x60xf32>
    %48 = arith.select %45, %43, %47 : vector<8x60xi1>, vector<8x60xf32>
    %cst_29 = arith.constant dense<0.000000e+00> : vector<8x8xf32>
    %49 = tpu.matmul %48, %48, %cst_29 {dimension_numbers = #tpu.dot_dimension_numbers<[1], [1], [0], [0], [0, 0, 1, 0], [], []>} : vector<8x60xf32>, vector<8x60xf32>, vector<8x8xf32> -> vector<8x8xf32>
    %cst_30 = arith.constant 0xFF800000 : f32
    %50 = vector.broadcast %cst_30 : f32 to vector<8x8xf32>
    %51 = arith.select %10, %49, %50 : vector<8x8xi1>, vector<8x8xf32>
    %cst_31 = arith.constant dense<0xFF800000> : vector<8xf32>
    %52 = vector.multi_reduction <maximumf>, %51, %cst_31 [1] : vector<8x8xf32> to vector<8xf32>
    %53 = vector.shape_cast %52 : vector<8xf32> to vector<8x1xf32>
    %54 = vector.broadcast %53 : vector<8x1xf32> to vector<8x8xf32>
    %55 = arith.subf %51, %54 : vector<8x8xf32>
    %56 = math.exp %55 : vector<8x8xf32>
    %cst_32 = arith.constant dense<0.000000e+00> : vector<8xf32>
    %57 = vector.multi_reduction <add>, %56, %cst_32 [1] : vector<8x8xf32> to vector<8xf32>
    %58 = vector.shape_cast %57 : vector<8xf32> to vector<8x1xf32>
    %59 = vector.broadcast %58 : vector<8x1xf32> to vector<8x8xf32>
    %60 = arith.divf %56, %59 : vector<8x8xf32>
    %cst_33 = arith.constant 0xFF800000 : f32
    %61 = vector.broadcast %cst_33 : f32 to vector<8x8xf32>
    %62 = arith.select %10, %61, %49 : vector<8x8xi1>, vector<8x8xf32>
    %cst_34 = arith.constant dense<0xFF800000> : vector<8xf32>
    %63 = vector.multi_reduction <maximumf>, %62, %cst_34 [1] : vector<8x8xf32> to vector<8xf32>
    %64 = vector.shape_cast %63 : vector<8xf32> to vector<8x1xf32>
    %65 = vector.broadcast %64 : vector<8x1xf32> to vector<8x8xf32>
    %66 = arith.subf %62, %65 : vector<8x8xf32>
    %67 = math.exp %66 : vector<8x8xf32>
    %cst_35 = arith.constant dense<0.000000e+00> : vector<8xf32>
    %68 = vector.multi_reduction <add>, %67, %cst_35 [1] : vector<8x8xf32> to vector<8xf32>
    %69 = vector.shape_cast %68 : vector<8xf32> to vector<8x1xf32>
    %70 = vector.broadcast %69 : vector<8x1xf32> to vector<8x8xf32>
    %71 = arith.divf %67, %70 : vector<8x8xf32>
    %72 = arith.mulf %16, %60 : vector<8x8xf32>
    %73 = arith.mulf %20, %71 : vector<8x8xf32>
    %74 = arith.addf %72, %73 : vector<8x8xf32>
    %cst_36 = arith.constant dense<0.000000e+00> : vector<8x4xf32>
    %75 = tpu.matmul %74, %4, %cst_36 {dimension_numbers = #tpu.dot_dimension_numbers<[1], [0], [0], [1], [0, 0, 1, 1], [], []>} : vector<8x8xf32>, vector<8x4xf32>, vector<8x4xf32> -> vector<8x4xf32>
    %76 = arith.truncf %75 : vector<8x4xf32> to vector<8x4xbf16>
    %77 = arith.truncf %22 : vector<4x256xf32> to vector<4x256xbf16>
    %cst_37 = arith.constant dense<0.000000e+00> : vector<8x256xf32>
    %78 = tpu.matmul %76, %77, %cst_37 {dimension_numbers = #tpu.dot_dimension_numbers<[1], [0], [0], [1], [0, 0, 1, 1], [], []>} : vector<8x4xbf16>, vector<4x256xbf16>, vector<8x256xf32> -> vector<8x256xf32>
    %cst_38 = arith.constant dense<0.000000e+00> : vector<4x256xf32>
    %79 = tpu.matmul %5, %78, %cst_38 {dimension_numbers = #tpu.dot_dimension_numbers<[1], [0], [0], [1], [0, 0, 1, 1], [], []>} : vector<4x8xf32>, vector<8x256xf32>, vector<4x256xf32> -> vector<4x256xf32>
    %80 = arith.addf %79, %22 : vector<4x256xf32>
    %c0_39 = arith.constant 0 : index
    %c0_40 = arith.constant 0 : index
    %c0_41 = arith.constant 0 : index
    %81 = vector.load %arg10[%c0_39, %c0_40, %c0_41] : memref<1x4x256xf32, #tpu.memory_space<vmem>>, vector<1x4x256xf32>
    %82 = vector.shape_cast %81 : vector<1x4x256xf32> to vector<4x256xf32>
    %83 = vector.shape_cast %80 : vector<4x256xf32> to vector<1x4x256xf32>
    tpu.vector_store %arg10[%c0_39, %c0_40, %c0_41], %83 {strides = array<i32>} : memref<1x4x256xf32, #tpu.memory_space<vmem>>, vector<1x4x256xf32>,
    %cst_42 = arith.constant dense<0.000000e+00> : vector<4x256xf32>
    %84 = tpu.matmul %6, %78, %cst_42 {dimension_numbers = #tpu.dot_dimension_numbers<[1], [0], [0], [1], [0, 0, 1, 1], [], []>} : vector<4x8xf32>, vector<8x256xf32>, vector<4x256xf32> -> vector<4x256xf32>
    %85 = arith.addf %84, %22 : vector<4x256xf32>
    %c0_43 = arith.constant 0 : index
    %c0_44 = arith.constant 0 : index
    %c0_45 = arith.constant 0 : index
    %86 = vector.load %arg11[%c0_43, %c0_44, %c0_45] : memref<1x4x256xf32, #tpu.memory_space<vmem>>, vector<1x4x256xf32>
    %87 = vector.shape_cast %86 : vector<1x4x256xf32> to vector<4x256xf32>
    %88 = vector.shape_cast %85 : vector<4x256xf32> to vector<1x4x256xf32>
    tpu.vector_store %arg11[%c0_43, %c0_44, %c0_45], %88 {strides = array<i32>} : memref<1x4x256xf32, #tpu.memory_space<vmem>>, vector<1x4x256xf32>,
    return
  }
  func.func @transform_0(%arg0: i32) -> (i32, i32, i32) {
    %c0_i32 = arith.constant 0 : i32
    %c0_i32_0 = arith.constant 0 : i32
    %c0_i32_1 = arith.constant 0 : i32
    return %arg0, %c0_i32, %c0_i32_0 : i32, i32, i32
  }
  func.func @transform_1(%arg0: i32) -> (i32, i32, i32) {
    %c0_i32 = arith.constant 0 : i32
    %c0_i32_0 = arith.constant 0 : i32
    %c0_i32_1 = arith.constant 0 : i32
    return %arg0, %c0_i32, %c0_i32_0 : i32, i32, i32
  }
  func.func @transform_2(%arg0: i32) -> (i32, i32) {
    %c0_i32 = arith.constant 0 : i32
    %c0_i32_0 = arith.constant 0 : i32
    %c0_i32_1 = arith.constant 0 : i32
    return %c0_i32, %c0_i32_0 : i32, i32
  }
  func.func @transform_3(%arg0: i32) -> (i32, i32) {
    %c0_i32 = arith.constant 0 : i32
    %c0_i32_0 = arith.constant 0 : i32
    %c0_i32_1 = arith.constant 0 : i32
    return %c0_i32, %c0_i32_0 : i32, i32
  }
  func.func @transform_4(%arg0: i32) -> (i32, i32) {
    %c0_i32 = arith.constant 0 : i32
    %c0_i32_0 = arith.constant 0 : i32
    %c0_i32_1 = arith.constant 0 : i32
    return %c0_i32, %c0_i32_0 : i32, i32
  }
  func.func @transform_5(%arg0: i32) -> (i32, i32) {
    %c0_i32 = arith.constant 0 : i32
    %c0_i32_0 = arith.constant 0 : i32
    %c0_i32_1 = arith.constant 0 : i32
    return %c0_i32, %c0_i32_0 : i32, i32
  }
  func.func @transform_6(%arg0: i32) -> (i32, i32) {
    %c0_i32 = arith.constant 0 : i32
    %c0_i32_0 = arith.constant 0 : i32
    %c0_i32_1 = arith.constant 0 : i32
    return %c0_i32, %c0_i32_0 : i32, i32
  }
  func.func @transform_7(%arg0: i32) -> (i32, i32) {
    %c0_i32 = arith.constant 0 : i32
    %c0_i32_0 = arith.constant 0 : i32
    %c0_i32_1 = arith.constant 0 : i32
    return %c0_i32, %c0_i32_0 : i32, i32
  }
  func.func @transform_8(%arg0: i32) -> (i32, i32) {
    %c0_i32 = arith.constant 0 : i32
    %c0_i32_0 = arith.constant 0 : i32
    %c0_i32_1 = arith.constant 0 : i32
    return %c0_i32, %c0_i32_0 : i32, i32
  }
  func.func @transform_9(%arg0: i32) -> (i32, i32, i32) {
    %c0_i32 = arith.constant 0 : i32
    %c0_i32_0 = arith.constant 0 : i32
    %c0_i32_1 = arith.constant 0 : i32
    return %arg0, %c0_i32, %c0_i32_0 : i32, i32, i32
  }
  func.func @transform_10(%arg0: i32) -> (i32, i32, i32) {
    %c0_i32 = arith.constant 0 : i32
    %c0_i32_0 = arith.constant 0 : i32
    %c0_i32_1 = arith.constant 0 : i32
    return %arg0, %c0_i32, %c0_i32_0 : i32, i32, i32
  }
}

</mosaic_0001>

<bundles_post_ra>
// kernel: ccn_forward.1
= control target key start
LH: loop header
LB: loop body
LE: loop exit
PB: predicated region body
PF: predicated region fallthrough
CT: control target
= control target key end

     0   :  { %s1169_s17 = smov 0   ;;  %s1246_s0 = inlined_call_operand.vmem [shape: f32[2,4,256], index: 0, kind: input, shape index: {}]   ;;  %s1247_s1 = inlined_call_operand.vmem [shape: f32[2,36,60], index: 1, kind: input, shape index: {}]   ;;  %s1248_s2 = inlined_call_operand.vmem [shape: f32[8,36], index: 2, kind: input, shape index: {}]   ;;  %s1249_s3 = inlined_call_operand.vmem [shape: f32[8,1], index: 3, kind: input, shape index: {}]   ;;  %s1250_s4 = inlined_call_operand.vmem [shape: f32[8,4], index: 4, kind: input, shape index: {}]   ;;  %s1251_s5 = inlined_call_operand.vmem [shape: f32[4,8], index: 5, kind: input, shape index: {}]   ;;  %s1252_s6 = inlined_call_operand.vmem [shape: f32[4,8], index: 6, kind: input, shape index: {}]   ;;  %s1253_s7 = inlined_call_operand.<no memory space> [shape: f32[1,1], index: 7, kind: input, shape index: {}]   ;;  %s1254_s8 = inlined_call_operand.<no memory space> [shape: f32[1,1], index: 8, kind: input, shape index: {}]   ;;  %s1255_s9 = inlined_call_operand.vmem [shape: f32[2,4,256], index: 9, kind: output, shape index: {0}]   ;;  %s1256_s10 = inlined_call_operand.vmem [shape: f32[2,4,256], index: 10, kind: output, shape index: {1}]  }
   0x1   :  { %16 = sst [smem:[#allocation2]] %s1253_s7 }
   0x2   :  { %17 = sst [smem:[#allocation3]] %s1254_s8 }
   0x3 LB: > { %s1014_s18 = sadd.s32 4294967295, %s1103_s17   ;;  %p1018_p0 = scmp.ge.s32.totalorder %s1103_s17, 1  ;;  %s1103_s17 = sphi %s1169_s17, %s23_s17  }
   0x4   : > { %p327_p1 = scmp.lt.s32.totalorder %s1103_s17, 3 }
   0x6   : > { %p328_p2 = pnand %p1018_p0, %p327_p1 }
   0x7   : > { %p375_p3 = scmp.lt.s32.totalorder (!%p328_p2), %s1014_s18, 1  ;;  %s397_s11 = sld [smem:[#allocation3]] (!%p328_p2) }
   0x8   : > { %331 = sbr.rel (%p328_p2) target bundleno = 1642 (0x66a), region = 56  ;;  %s396_s12 = sld [smem:[#allocation2]] (!%p328_p2) }
   0xd   : > { %v1105_v0 = vmov 0.0   ;;  %vm1106_vm0 = vmmov 0   ;;  %v399_v1 = vld [vmem:[%s1249_s3] sm:$0xff]  ;;  %s1258_s18 = smov (!%p375_p3, %s1014_s18), 1  ;;  %v1107_v2 = vmov 0   ;;  %vm432_vm1 = vcmask 1043456  }
   0xe   : > { %1050 = vmatprep.subr.mxu0 %v1105_v0  ;;  %1060 = vmatprep.mubr.msk.f32.mxu0 %vm1106_vm0, %v1105_v0  ;;  %s1073_s19 = smul.u32 40, %s1258_s18  ;;  %v398_v8 = vld [vmem:[%s1248_s2] sm:$0xff]  ;;  %vm428_vm2 = vcmask 293888   ;;  %vm506_vm3 = vcmask 490496   ;;  %v403_v26 = vlaneseq  ;;  %vm598_vm6 = vcmask 64512   ;;  %s1213_s25 = sshll.u32 %s1258_s18, 3 }
   0xf   : > { %1085 = vset.pattern.permute.xlu0 %v1107_v2  ;;  %1063 = vmatprep.subr.mxu1 %v1105_v0  ;;  %s379_s28 = scalar_lea.vmem %s1246_s0, %s1213_s25  ;;  %v400_v44 = vld [vmem:[%s1250_s4] sm:$0xff]  ;;  %vm708_vm7 = vcmask 1041408   ;;  %s413_s13 = ssub.f32 1.0, %s396_s12  ;;  %v410_v52 = vstv %s396_s12  ;;  %v415_v55 = vstv %s397_s11  ;;  %vm704_vm9 = vcmask 31744  }
  0x10   : > { %425 = vperm.xlu0 %1085, %v399_v1   ;;  %1065 = vmatprep.mubr.msk.f32.mxu1 %vm1106_vm0, %v1105_v0  ;;  %s384_s22 = scalar_lea.vmem %s1247_s1, %s1073_s19  ;;  %v404_v27 = vand.u32 127, %v403_v26  ;;  %v417_v45 = vld [vmem:[%s379_s28] sm:$0xff]  ;;  %v406_v50 = vshrl.u32 %v403_v26, 7  ;;  %s409_s14 = ssub.f32 1.0, %s397_s11 }
  0x11   : > { %v422_v3 = vld [vmem:[%s384_s22 + $0x20] sm:$0xf]  ;;  %v421_v4 = vld [vmem:[%s384_s22 + $0x18] sm:$0xff]  ;;  %v420_v5 = vld [vmem:[%s384_s22 + $0x10] sm:$0xff]  ;;  %v700_v46 = vcombine.high %v417_v45, %v417_v45  ;;  %v414_v54 = vstv %s413_s13  ;;  %v702_v1 = vpack.c.bf16 %v417_v45, %v417_v45  ;;  %s389_s20 = scalar_lea.vmem %s1255_s9, %s1213_s25  ;;  %s394_s23 = scalar_lea.vmem %s1256_s10, %s1213_s25 }
  0x12   : > { %1051 = vmatpush3.msk.msra.mxu0 %vm432_vm1, %v422_v3  ;;  %v419_v6 = vld [vmem:[%s384_s22 + $0x8] sm:$0xff]  ;;  %v418_v7 = vld [vmem:[%s384_s22] sm:$0xff]  ;;  %vm407_vm5 = vcmp.lt.s32.totalorder %v404_v27, 4  ;;  %vm408_vm8 = vcmp.lt.s32.totalorder %v406_v50, 4  ;;  %v411_v53 = vstv %s409_s14 }
  0x13   : > { %1052 = vmatprep.subr.mxu0 %v1105_v0  ;;  %v703_v47 = vpack.c.bf16 %v700_v46, %v700_v46  ;;  %v412_v58 = vsel %vm408_vm8, %v410_v52, %v411_v53  ;;  %v416_v59 = vsel %vm408_vm8, %v414_v54, %v415_v55  ;;  %v710_v3 = vsel %vm708_vm7, %v702_v1, 0 }
  0x14   : > { %1053 = vmatpush3.msra.mxu0 %v421_v4 }
  0x15   : > { %1054 = vmatprep.subr.mxu0 %v1105_v0 }
  0x16   : > { %1055 = vmatpush3.msra.mxu0 %v420_v5 }
  0x17   : > { %1056 = vmatprep.subr.mxu0 %v1105_v0 }
  0x18   : > { %1057 = vmatpush3.msra.mxu0 %v419_v6 }
  0x19   : > { %1058 = vmatprep.subr.mxu0 %v1105_v0 }
  0x1a   : > { %1059 = vmatpush3.msra.mxu0 %v418_v7 }
  0x1b   : > { %1061 = vmatmul.mubr.msk.f32.vlgmr.msra.gmra.mxu0 %vm428_vm2, %v398_v8 }
  0x1c   : > { %823 = vmatprep.mubr.f32.mxu0 %v1105_v0 }
  0x8b   : > { %v426_v9 = vpop.permute.xlu0 %425 }
  0xdb   : > { %v502_v10 = vpop.f32.mrf.mxu0 }
  0xdc   : > { %v503_v11 = vadd.f32 %v502_v10, %v426_v9  ;;  %v401_v9 = vld [vmem:[%s1251_s5] sm:$0xf] }
  0xdd   : > { %v1062_v12 = vpop.f32.mrf.mxu0 }
  0xde   : > { %v507_v13 = vsel %vm506_vm3, %v503_v11, 0.0 }
  0xdf   : > { %508 = vadd.xlane.f32.xlu0 %v507_v13 }
 0x168   : > { %v509_v14 = vpop.xlane.xlu0 %508 }
 0x169   : > { %v511_v15 = vmul.f32 0.016666668, %v509_v14 }
 0x16b   : > { %v512_v16 = vsub.f32 %v503_v11, %v511_v15  ;;  %v402_v11 = vld [vmem:[%s1252_s6] sm:$0xf] }
 0x16d   : > { %v513_v17 = vmul.f32 %v512_v16, %v512_v16 }
 0x16f   : > { %v514_v18 = vsel %vm506_vm3, %v513_v17, 0.0 }
 0x170   : > { %515 = vadd.xlane.f32.xlu1 %v514_v18 }
 0x1f9   : > { %v516_v19 = vpop.xlane.xlu1 %515 }
 0x1fa   : > { %v517_v20 = vmul.f32 0.016666668, %v516_v19 }
 0x1fc   : > { %v518_v21 = vadd.f32 1e-05, %v517_v20 }
 0x1fe   : > { %1087 = vrsqrt.f32 %v518_v21 }
 0x20b   : > { %v1088_v22 = vpop.eup %1087 }
 0x20c   : > { %v520_v23 = vmul.f32 %v1088_v22, %v512_v16 }
 0x20e   : > { %vm521_vm4 = vcmp.ge.f32.partialorder %v520_v23, 0.0  ;;  %v522_v24 = vmul.f32 0.3, %v520_v23 }
 0x210   : > { %v523_v25 = vsel %vm521_vm4, %v520_v23, %v522_v24 }
 0x211   : > { %1064 = vmatpush3.xpose.msk.msra.mxu1 %vm506_vm3, %v523_v25 }
 0x212   : > { %1068 = vmatprep.subr.mxu1 %v1105_v0 }
 0x214   : > { %1066 = vmatmul.mubr.msk.f32.vlgmr.msra.gmra.mxu1 %vm506_vm3, %v523_v25 }
 0x215   : > { %1070 = vmatprep.mubr.msk.f32.mxu1 %vm1106_vm0, %v1105_v0  ;;  %1069 = vmatpush3.msra.mxu1 %v400_v44 }
 0x216   : > { %1031 = vmatprep.subr.msk.bf16.mxu1 %vm708_vm7, %v703_v47 }
 0x2d4   : > { %v593_v28 = vpop.f32.mrf.mxu1 }
 0x2d5   : > { %v597_v29 = vsel %vm407_vm5, %v593_v28, -inf  ;;  %v610_v32 = vsel %vm407_vm5, -inf, %v593_v28 }
 0x2d6   : > { %v1067_v30 = vpop.f32.mrf.mxu1  ;;  %v599_v31 = vsel %vm598_vm6, %v597_v29, -inf  ;;  %v611_v33 = vsel %vm598_vm6, %v610_v32, -inf }
 0x2d7   : > { %600 = vmax.xlane.f32.xlu1 %v599_v31 }
 0x2db   : > { %612 = vmax.xlane.f32.xlu1 %v611_v33 }
 0x360   : > { %v601_v34 = vpop.xlane.xlu1 %600 }
 0x361   : > { %v602_v35 = vsub.f32 %v597_v29, %v601_v34 }
 0x363   : > { %v603_v36 = vmul.f32 1.442695, %v602_v35 }
 0x364   : > { %v613_v37 = vpop.xlane.xlu1 %612 }
 0x365   : > { %1089 = vpow2.f32 %v603_v36  ;;  %v614_v38 = vsub.f32 %v610_v32, %v613_v37 }
 0x367   : > { %v615_v39 = vmul.f32 1.442695, %v614_v38 }
 0x369   : > { %1091 = vpow2.f32 %v615_v39 }
 0x372   : > { %v1090_v40 = vpop.eup %1089 }
 0x373   : > { %v605_v41 = vsel %vm598_vm6, %v1090_v40, 0.0 }
 0x374   : > { %606 = vadd.xlane.f32.xlu1 %v605_v41 }
 0x376   : > { %v1092_v42 = vpop.eup %1091 }
 0x377   : > { %v617_v43 = vsel %vm598_vm6, %v1092_v42, 0.0 }
 0x378   : > { %618 = vadd.xlane.f32.xlu1 %v617_v43 }
 0x3fd   : > { %v607_v48 = vpop.xlane.xlu1 %606 }
 0x3fe   : > { %1093 = vrcp.f32 %v607_v48 }
 0x401   : > { %v619_v49 = vpop.xlane.xlu1 %618 }
 0x402   : > { %1095 = vrcp.f32 %v619_v49 }
 0x40b   : > { %v1094_v51 = vpop.eup %1093 }
 0x40c   : > { %v609_v56 = vmul.f32 %v1094_v51, %v1090_v40 }
 0x40e   : > { %v622_v61 = vmul.f32 %v609_v56, %v412_v58 }
 0x40f   : > { %v1096_v57 = vpop.eup %1095 }
 0x410   : > { %v621_v60 = vmul.f32 %v1096_v57, %v1092_v42 }
 0x412   : > { %v623_v62 = vmul.f32 %v621_v60, %v416_v59 }
 0x414   : > { %v624_v63 = vadd.f32 %v623_v62, %v622_v61 }
 0x416   : > { %1071 = vmatmul.mubr.msk.f32.vlgmr.msra.gmra.mxu1 %vm598_vm6, %v624_v63 }
 0x417   : > { %747 = vmatprep.mubr.bf16.mxu1 %v1107_v2  ;;  %730 = vmatpush1.bf16.msra.mxu1 %v710_v3 }
 0x4d6   : > { %v694_v4 = vpop.f32.mrf.mxu1 }
 0x4d7   : > { %v698_v5 = vpack.c.bf16 %v694_v4, %v694_v4 }
 0x4d8   : > { %v1072_v6 = vpop.f32.mrf.mxu1 }
 0x4d9   : > { %1032 = vmatmul.mubr.msk.bf16.vlgmr.msra.gmra.mxu1 %vm704_vm9, %v698_v5 }
 0x599   : > { %v749_v7 = vpop.f32.mrf.mxu1 }
 0x59b   : > { %v751_v8 = vpop.f32.mrf.mxu1 }
 0x59c   : > { %789 = vmatprep.subr.mxu0 %v751_v8 }
 0x59d   : > { %v753_v10 = vpop.f32.mrf.mxu1  ;;  %790 = vmatpush1.msra.mxu0 %v749_v7 }
 0x59e   : > { %868 = vmatprep.subr.mxu0 %v751_v8  ;;  %1033 = vmatmul.mubr.msk.f32.vlgmr.msra.gmra.mxu0 %vm598_vm6, %v401_v9 }
 0x59f   : > { %v754_v2 = vpop.f32.mrf.mxu1  ;;  %869 = vmatpush1.msra.mxu0 %v749_v7  ;;  %902 = vmatprep.mubr.f32.mxu0 %v1105_v0 }
 0x5a2   : > { %1034 = vmatmul.mubr.msk.f32.vlgmr.msra.gmra.mxu0 %vm598_vm6, %v402_v11 }
 0x65e   : > { %v825_v12 = vpop.f32.mrf.mxu0 }
 0x65f   : > { %v826_v14 = vadd.f32 %v825_v12, %v417_v45 }
 0x660   : > { %v827_v13 = vpop.f32.mrf.mxu0 }
 0x661   : > { %v828_v15 = vadd.f32 %v827_v13, %v700_v46 }
 0x662   : > { %v904_v16 = vpop.f32.mrf.mxu0 }
 0x663   : > { %v832_v17 = vcombine.low %v826_v14, %v828_v15  ;;  %v905_v19 = vadd.f32 %v904_v16, %v417_v45 }
 0x664   : > { %v906_v18 = vpop.f32.mrf.mxu0 }
 0x665   : > { %834 = vst [vmem:[%s389_s20] sm:$0xff] %v832_v17  ;;  %v907_v0 = vadd.f32 %v906_v18, %v700_v46 }
 0x667   : > { %v911_v20 = vcombine.low %v905_v19, %v907_v0 }
 0x669   : > { %913 = vst [vmem:[%s394_s23] sm:$0xff] %v911_v20 }
 0x66a PF: > { %s23_s17 = sadd.s32 1, %s1103_s17  }
 0x66b   : > { %p20_p4 = scmp.ge.s32.totalorder %s23_s17, 4  }
 0x66d   :  { %22 = sbr.rel (!%p20_p4) target bundleno = 3 (0x3), region = 101 }

</bundles_post_ra>
